<compile_context>
chip_gen: v6e
topology: v6e:2x2x1
jax: 0.10.0
libtpu: 0.0.40
codegen_flags: <defaults>
</compile_context>

<pallas_src>
import functools

import jax
import jax.numpy as jnp
from jax.experimental import pallas as pl
from jax.experimental.pallas import tpu as pltpu


def _round_up(x, m):
    return ((x + m - 1) // m) * m


# ----------------------------------------------------------------------------
# Kernel 1: fused patch encoder (conv-as-matmul) + vector quantization (argmin)
#   patches tile (TN, P) -> z (TN, D) -> distances (K, TN) -> tokens (1, TN)
#   Token output is lane-dense (N on the lane axis, TN a multiple of 128).
# ----------------------------------------------------------------------------
def _encode_quantize_kernel(patches_ref, w_ref, b_ref, codebook_ref, e_sq_ref,
                            tok_ref):
    f32 = jnp.float32

    # conv-as-matmul patch encoding. Kept in f32: the result feeds the VQ argmin, where
    # bf16 rounding can flip near-tie token ids relative to torch.argmin.
    x = patches_ref[...].astype(f32)                                     # (TN, P)
    z = jnp.dot(x, w_ref[...], preferred_element_type=f32) + b_ref[...]  # (TN, D)

    # squared-L2 argmin over the codebook. ||z||^2 is constant per row and does not
    # change the argmin, so only ||e||^2 - 2 e.z is computed. Distances are laid out
    # (K, TN): the reduction runs over sublanes and the token row stays lane-dense.
    e = codebook_ref[...]                                                # (K, D) f32
    cross = jax.lax.dot_general(e, z, (((1,), (1,)), ((), ())),
                                preferred_element_type=f32)              # (K, TN)
    dist = e_sq_ref[...] - 2.0 * cross                                   # (K, TN)

    # First-occurrence argmin, fused compare+select into one index-min reduction.
    # (Kept manual instead of jnp.argmin for portable Mosaic lowering.)
    K = dist.shape[0]
    min_d = jnp.min(dist, axis=0, keepdims=True)                         # (1, TN)
    ridx = jax.lax.broadcasted_iota(jnp.int32, dist.shape, 0)
    tok_ref[...] = jnp.min(jnp.where(dist <= min_d, ridx, K),
                           axis=0, keepdims=True).astype(jnp.int32)      # (1, TN)


def encode_and_quantize_tokens(patches, w, b, codebook, *, tile_n=512):
    """patches (N, P) -> token ids (N,) int32. Tiled over N; codebook stays resident."""
    N, P = patches.shape
    K, D = codebook.shape

    # Token blocks are always 128-lane dense (unmasked stores). For mid-size N we use
    # 128-wide tiles so the "parallel" grid has >= 2 steps (both v7x TensorCores busy);
    # large N uses tile_n-wide tiles to amortize the ~0.35us per-grid-step overhead.
    Np = _round_up(N, 128)
    if Np <= 128:
        TN = Np
    elif Np <= 2 * tile_n:
        TN = 128
    else:
        TN = tile_n
        Np = _round_up(Np, TN)
    if Np != N:
        patches = jnp.pad(patches, ((0, Np - N), (0, 0)))

    # hoist ||e||^2 out of the grid loop (codebook block is grid-resident)
    e_sq = jnp.sum(codebook.astype(jnp.float32) ** 2, axis=-1, keepdims=True)   # (K, 1)

    tok = pl.pallas_call(
        _encode_quantize_kernel,
        out_shape=jax.ShapeDtypeStruct((1, Np), jnp.int32),
        grid=(Np // TN,),
        in_specs=[
            pl.BlockSpec((TN, P), lambda i: (i, 0)),     # patches tile (pipelined)
            pl.BlockSpec((P, D), lambda i: (0, 0)),      # weights resident
            pl.BlockSpec((1, D), lambda i: (0, 0)),
            pl.BlockSpec((K, D), lambda i: (0, 0)),      # codebook resident
            pl.BlockSpec((K, 1), lambda i: (0, 0)),
        ],
        out_specs=pl.BlockSpec((1, TN), lambda i: (0, i)),
        compiler_params=pltpu.CompilerParams(dimension_semantics=("parallel",)),
    )(patches, w, b, codebook, e_sq)
    return tok[0, :N]


# ----------------------------------------------------------------------------
# Kernel 2: fused transformer (embedding lookup + pre-LN attention + MLP + head)
#   grid=(B,) "parallel": one batch element per grid step (megacore shards the batch).
# ----------------------------------------------------------------------------
def _layernorm(h):
    mu = jnp.mean(h, axis=-1, keepdims=True)
    var = jnp.mean((h - mu) ** 2, axis=-1, keepdims=True)
    return (h - mu) * jax.lax.rsqrt(var + 1e-5)


def _transformer_kernel(l_cond,
                        tok_ref, pos_ref, emb_ref,
                        wq_ref, wk_ref, wv_ref, wo_ref,
                        w1_ref, b1_ref, w2_ref, b2_ref,
                        whead_ref, bhead_ref,
                        logits_ref):
    f32, bf16 = jnp.float32, jnp.bfloat16
    T, D = pos_ref.shape
    Kv = emb_ref.shape[0]

    # --- embedding gather as one-hot matmul (exact in f32) + positional add ---------
    # TODO(synk): at real VQ-Diffusion vocab sizes (Kv in the thousands) replace this
    # with a scalar-prefetch row gather; at Kv=192 the one-hot matmul is cheaper.
    tok = tok_ref[...]                                                   # (T, 1) int32
    iota_v = jax.lax.broadcasted_iota(jnp.int32, (T, Kv), 1)
    onehot = (iota_v == tok).astype(f32)
    emb = jnp.dot(onehot, emb_ref[...], preferred_element_type=f32)      # (T, D)
    h = emb + pos_ref[...]                                               # broadcast-free add

    # --- pre-LN self attention (single head over the full token dim) ----------------
    hn = _layernorm(h).astype(bf16)
    q = jnp.dot(hn, wq_ref[...].astype(bf16), preferred_element_type=f32)
    k = jnp.dot(hn, wk_ref[...].astype(bf16), preferred_element_type=f32)
    v = jnp.dot(hn, wv_ref[...].astype(bf16), preferred_element_type=f32)
    scale = 1.0 / jnp.sqrt(jnp.float32(D))
    s = jax.lax.dot_general(q.astype(bf16), k.astype(bf16),
                            (((1,), (1,)), ((), ())),
                            preferred_element_type=f32) * scale          # (T, T)
    s = s - jnp.max(s, axis=-1, keepdims=True)
    p = jnp.exp(s)
    p = p * pl.reciprocal(jnp.sum(p, axis=-1, keepdims=True), approx=True)
    a = jnp.dot(p.astype(bf16), v.astype(bf16), preferred_element_type=f32)
    h = h + jnp.dot(a.astype(bf16), wo_ref[...].astype(bf16),
                    preferred_element_type=f32)

    # --- pre-LN MLP ------------------------------------------------------------------
    hn2 = _layernorm(h).astype(bf16)
    m = jnp.dot(hn2, w1_ref[...].astype(bf16), preferred_element_type=f32) + b1_ref[...]
    m = jax.nn.gelu(m, approximate=True)   # TODO(synk): torch nn.GELU default is exact erf
    h = h + jnp.dot(m.astype(bf16), w2_ref[...].astype(bf16),
                    preferred_element_type=f32) + b2_ref[...]

    # --- logits over the content codebook, content rows only --------------------------
    # One static, sublane-aligned slice (l_cond is a multiple of 8) — no copies/concat.
    y = h[l_cond:, :]                                                    # (Lc, D)
    logits = jnp.dot(y.astype(bf16), whead_ref[...].astype(bf16),
                     preferred_element_type=f32) + bhead_ref[...]        # (Lc, Kcont)
    logits_ref[...] = logits[None, :, :]


def transformer_forward(condition_token, content_token, tparams):
    B, Lv = condition_token.shape
    _, Lc = content_token.shape
    T = Lv + Lc
    Kc, D = tparams["cond_tok_embed"].shape
    Kcont = tparams["cont_tok_embed"].shape[0]
    H = tparams["w1"].shape[1]

    # combined vocabulary: [condition table ; content table], content ids offset by Kc
    emb_all = jnp.concatenate([tparams["cond_tok_embed"], tparams["cont_tok_embed"]], axis=0)
    tok_all = jnp.concatenate([condition_token, content_token + Kc], axis=1)  # (B, T)
    tok_col = tok_all.reshape(B * T, 1).astype(jnp.int32)

    def resident(shape):
        nd = len(shape)
        return pl.BlockSpec(shape, lambda b, _nd=nd: (0,) * _nd)

    # TODO(synk): at realistic D/Kcont sizes, stream emb_all / whead over extra grid
    # axes and set vmem_limit_bytes explicitly for v7x's 64 MiB VMEM; at these toy
    # dims everything fits comfortably resident.
    logits = pl.pallas_call(
        functools.partial(_transformer_kernel, Lv),
        out_shape=jax.ShapeDtypeStruct((B, Lc, Kcont), jnp.float32),
        grid=(B,),
        in_specs=[
            pl.BlockSpec((T, 1), lambda b: (b, 0)),      # this batch's token column
            resident((T, D)),                            # pos_embed passed once
            resident((Kc + Kcont, D)),
            resident((D, D)), resident((D, D)), resident((D, D)), resident((D, D)),
            resident((D, H)), resident((1, H)),
            resident((H, D)), resident((1, D)),
            resident((D, Kcont)), resident((1, Kcont)),
        ],
        out_specs=pl.BlockSpec((1, Lc, Kcont), lambda b: (b, 0, 0)),
        compiler_params=pltpu.CompilerParams(dimension_semantics=("parallel",)),
    )(tok_col, tparams["pos_embed"], emb_all,
      tparams["wq"], tparams["wk"], tparams["wv"], tparams["wo"],
      tparams["w1"], tparams["b1"], tparams["w2"], tparams["b2"],
      tparams["whead"], tparams["bhead"])
    return logits


# ----------------------------------------------------------------------------
# Glue: NCHW -> patch matrix (equivalent to a stride-p Conv2d unfold)
# ----------------------------------------------------------------------------
def patchify_nchw(x, p):
    B, C, H, W = x.shape
    x = x.reshape(B, C, H // p, p, W // p, p)
    x = jnp.transpose(x, (0, 2, 4, 1, 3, 5))          # (B, Hp, Wp, C, p, p)
    return x.reshape(B * (H // p) * (W // p), C * p * p)


def codec_get_tokens(x_nchw, codec_params, patch):
    B = x_nchw.shape[0]
    patches = patchify_nchw(x_nchw, patch)
    tok = encode_and_quantize_tokens(patches, codec_params["w"],
                                     codec_params["b"], codec_params["codebook"])
    return tok.reshape(B, -1)                          # (B, L) int32 token ids


# ----------------------------------------------------------------------------
# Semantic_CD.forward equivalent
# ----------------------------------------------------------------------------
def semantic_cd_forward(params, batch):
    patch = params["patch"]

    # prepare_condition: condition_codec.get_tokens(batch['semantic'])
    # TODO(synk): could be merged with the content-codec launch via scalar-prefetched
    # per-tile codec selection; kept separate since the codecs have different P/K.
    condition_token = codec_get_tokens(batch["semantic"], params["cond_codec"], patch)

    # prepare_content: content_codec.get_tokens(batch['image']) and negative images,
    # batched through ONE encoder call (tokenization is per-patch independent, so
    # batching is exactly equivalent to the original per-sample loop).
    neg = batch.get("negative_img", None)
    if neg is not None:
        imgs_all = jnp.concatenate([batch["image"], neg], axis=0)
        tok_all = codec_get_tokens(imgs_all, params["content_codec"], patch)
        B = batch["image"].shape[0]
        content_token = tok_all[:B]
        negative_token = tok_all[B:]
    else:
        content_token = codec_get_tokens(batch["image"], params["content_codec"], patch)
        negative_token = None

    # transformer(input): fused embedding + attention block + MLP + content-codebook head
    logits = transformer_forward(condition_token, content_token, params["transformer"])

    # TODO(synk): the real diffusion transformer (instantiate_from_config) computes a
    # training loss over noised tokens; its internals are not defined in this file, so
    # we return the content-position logits plus the prepared tokens instead.
    return {
        "logits": logits,
        "condition_token": condition_token,
        "content_token": content_token,
        "negative_token": negative_token,
    }


# ----------------------------------------------------------------------------
# Deterministic parameter construction
# ----------------------------------------------------------------------------
def init_params(key, *, patch=4, c_img=3, c_sem=1, d=32, k_content=128, k_cond=64,
                l_cond=16, l_cont=16, mlp_hidden=64):
    keys = jax.random.split(key, 16)
    s = 0.02
    p_img = c_img * patch * patch
    p_sem = c_sem * patch * patch
    params = {
        "patch": patch,
        "content_codec": {
            "w": s * jax.random.normal(keys[0], (p_img, d), jnp.float32),
            "b": jnp.zeros((1, d), jnp.float32),
            "codebook": s * jax.random.normal(keys[1], (k_content, d), jnp.float32),
        },
        "cond_codec": {
            "w": s * jax.random.normal(keys[2], (p_sem, d), jnp.float32),
            "b": jnp.zeros((1, d), jnp.float32),
            "codebook": s * jax.random.normal(keys[3], (k_cond, d), jnp.float32),
        },
        "transformer": {
            "cond_tok_embed": s * jax.random.normal(keys[4], (k_cond, d), jnp.float32),
            "cont_tok_embed": s * jax.random.normal(keys[5], (k_content, d), jnp.float32),
            "pos_embed": s * jax.random.normal(keys[6], (l_cond + l_cont, d), jnp.float32),
            "wq": s * jax.random.normal(keys[7], (d, d), jnp.float32),
            "wk": s * jax.random.normal(keys[8], (d, d), jnp.float32),
            "wv": s * jax.random.normal(keys[9], (d, d), jnp.float32),
            "wo": s * jax.random.normal(keys[10], (d, d), jnp.float32),
            "w1": s * jax.random.normal(keys[11], (d, mlp_hidden), jnp.float32),
            "b1": jnp.zeros((1, mlp_hidden), jnp.float32),
            "w2": s * jax.random.normal(keys[12], (mlp_hidden, d), jnp.float32),
            "b2": jnp.zeros((1, d), jnp.float32),
            "whead": s * jax.random.normal(keys[13], (d, k_content), jnp.float32),
            "bhead": jnp.zeros((1, k_content), jnp.float32),
        },
    }
    return params


if __name__ == "__main__":
    key = jax.random.PRNGKey(0)
    k_img, k_sem, k_neg, k_par = jax.random.split(key, 4)

    B, H, W = 2, 16, 16
    batch = {
        "image": jax.random.normal(k_img, (B, 3, H, W), jnp.float32),        # NCHW
        "semantic": jax.random.normal(k_sem, (B, 1, H, W), jnp.float32),     # NCHW
        "negative_img": jax.random.normal(k_neg, (2, 3, H, W), jnp.float32), # NCHW
    }

    params = init_params(k_par)
    out = semantic_cd_forward(params, batch)
    jax.block_until_ready(out["logits"])
    jax.block_until_ready(out["content_token"])
    jax.block_until_ready(out["condition_token"])
    jax.block_until_ready(out["negative_token"])

    assert out["logits"].shape == (B, 16, 128)
    assert out["content_token"].shape == (B, 16)
    assert out["condition_token"].shape == (B, 16)
    assert out["negative_token"].shape == (2, 16)
    assert out["logits"].dtype == jnp.float32
    assert out["content_token"].dtype == jnp.int32
    print("KERNEL_OK")
</pallas_src>

<mosaic_0001>
module attributes {stable_mosaic.version = 11 : i64} {
  func.func @_encode_quantize_kernel(%arg0: i32, %arg1: memref<128x16xf32, #tpu.memory_space<vmem>>, %arg2: memref<16x32xf32, #tpu.memory_space<vmem>>, %arg3: memref<1x32xf32, #tpu.memory_space<vmem>>, %arg4: memref<64x32xf32, #tpu.memory_space<vmem>>, %arg5: memref<64x1xf32, #tpu.memory_space<vmem>>, %arg6: memref<1x128xi32, #tpu.memory_space<vmem>>) attributes {dimension_semantics = [#tpu.dimension_semantics<parallel>], iteration_bounds = array<i64: 1>, scalar_prefetch = 0 : i64, scratch_operands = 0 : i64, tpu.core_type = #tpu.core_type<tc>, window_params = [{transform_indices = @transform_0, window_bounds = array<i64: 128, 16>}, {pipeline_mode = #tpu.pipeline_mode<synchronous>, transform_indices = @transform_1, window_bounds = array<i64: 16, 32>}, {pipeline_mode = #tpu.pipeline_mode<synchronous>, transform_indices = @transform_2, window_bounds = array<i64: 1, 32>}, {pipeline_mode = #tpu.pipeline_mode<synchronous>, transform_indices = @transform_3, window_bounds = array<i64: 64, 32>}, {pipeline_mode = #tpu.pipeline_mode<synchronous>, transform_indices = @transform_4, window_bounds = array<i64: 64, 1>}, {transform_indices = @transform_5, window_bounds = array<i64: 1, 128>}]} {
    %c0 = arith.constant 0 : index
    %c0_0 = arith.constant 0 : index
    %0 = vector.load %arg1[%c0, %c0_0] : memref<128x16xf32, #tpu.memory_space<vmem>>, vector<128x16xf32>
    %c0_1 = arith.constant 0 : index
    %c0_2 = arith.constant 0 : index
    %1 = vector.load %arg2[%c0_1, %c0_2] : memref<16x32xf32, #tpu.memory_space<vmem>>, vector<16x32xf32>
    %cst = arith.constant dense<0.000000e+00> : vector<128x32xf32>
    %2 = tpu.matmul %0, %1, %cst {dimension_numbers = #tpu.dot_dimension_numbers<[1], [0], [0], [1], [0, 0, 1, 1], [], []>} : vector<128x16xf32>, vector<16x32xf32>, vector<128x32xf32> -> vector<128x32xf32>
    %c0_3 = arith.constant 0 : index
    %c0_4 = arith.constant 0 : index
    %3 = vector.load %arg3[%c0_3, %c0_4] : memref<1x32xf32, #tpu.memory_space<vmem>>, vector<1x32xf32>
    %4 = vector.broadcast %3 : vector<1x32xf32> to vector<128x32xf32>
    %5 = arith.addf %2, %4 : vector<128x32xf32>
    %c0_5 = arith.constant 0 : index
    %c0_6 = arith.constant 0 : index
    %6 = vector.load %arg4[%c0_5, %c0_6] : memref<64x32xf32, #tpu.memory_space<vmem>>, vector<64x32xf32>
    %cst_7 = arith.constant dense<0.000000e+00> : vector<64x128xf32>
    %7 = tpu.matmul %6, %5, %cst_7 {dimension_numbers = #tpu.dot_dimension_numbers<[1], [1], [0], [0], [0, 0, 1, 0], [], []>} : vector<64x32xf32>, vector<128x32xf32>, vector<64x128xf32> -> vector<64x128xf32>
    %c0_8 = arith.constant 0 : index
    %c0_9 = arith.constant 0 : index
    %8 = vector.load %arg5[%c0_8, %c0_9] : memref<64x1xf32, #tpu.memory_space<vmem>>, vector<64x1xf32>
    %cst_10 = arith.constant 2.000000e+00 : f32
    %9 = vector.broadcast %cst_10 : f32 to vector<64x128xf32>
    %10 = arith.mulf %9, %7 : vector<64x128xf32>
    %11 = vector.broadcast %8 : vector<64x1xf32> to vector<64x128xf32>
    %12 = arith.subf %11, %10 : vector<64x128xf32>
    %cst_11 = arith.constant dense<0x7F800000> : vector<128xf32>
    %13 = vector.multi_reduction <minimumf>, %12, %cst_11 [0] : vector<64x128xf32> to vector<128xf32>
    %14 = vector.shape_cast %13 : vector<128xf32> to vector<1x128xf32>
    %15 = tpu.iota {dimensions = array<i32: 0>} : vector<64x128xi32>
    %16 = vector.broadcast %14 : vector<1x128xf32> to vector<64x128xf32>
    %17 = arith.cmpf ole, %12, %16 : vector<64x128xf32>
    %c64_i32 = arith.constant 64 : i32
    %18 = vector.broadcast %c64_i32 : i32 to vector<64x128xi32>
    %19 = arith.select %17, %15, %18 : vector<64x128xi1>, vector<64x128xi32>
    %cst_12 = arith.constant dense<2147483647> : vector<128xi32>
    %20 = vector.multi_reduction <minsi>, %19, %cst_12 [0] : vector<64x128xi32> to vector<128xi32>
    %21 = vector.shape_cast %20 : vector<128xi32> to vector<1x128xi32>
    %c0_13 = arith.constant 0 : index
    %c0_14 = arith.constant 0 : index
    %22 = vector.load %arg6[%c0_13, %c0_14] : memref<1x128xi32, #tpu.memory_space<vmem>>, vector<1x128xi32>
    tpu.vector_store %arg6[%c0_13, %c0_14], %21 {strides = array<i32>} : memref<1x128xi32, #tpu.memory_space<vmem>>, vector<1x128xi32>,
    return
  }
  func.func @transform_0(%arg0: i32) -> (i32, i32) {
    %c0_i32 = arith.constant 0 : i32
    %c0_i32_0 = arith.constant 0 : i32
    return %arg0, %c0_i32 : i32, i32
  }
  func.func @transform_1(%arg0: i32) -> (i32, i32) {
    %c0_i32 = arith.constant 0 : i32
    %c0_i32_0 = arith.constant 0 : i32
    %c0_i32_1 = arith.constant 0 : i32
    return %c0_i32, %c0_i32_0 : i32, i32
  }
  func.func @transform_2(%arg0: i32) -> (i32, i32) {
    %c0_i32 = arith.constant 0 : i32
    %c0_i32_0 = arith.constant 0 : i32
    %c0_i32_1 = arith.constant 0 : i32
    return %c0_i32, %c0_i32_0 : i32, i32
  }
  func.func @transform_3(%arg0: i32) -> (i32, i32) {
    %c0_i32 = arith.constant 0 : i32
    %c0_i32_0 = arith.constant 0 : i32
    %c0_i32_1 = arith.constant 0 : i32
    return %c0_i32, %c0_i32_0 : i32, i32
  }
  func.func @transform_4(%arg0: i32) -> (i32, i32) {
    %c0_i32 = arith.constant 0 : i32
    %c0_i32_0 = arith.constant 0 : i32
    %c0_i32_1 = arith.constant 0 : i32
    return %c0_i32, %c0_i32_0 : i32, i32
  }
  func.func @transform_5(%arg0: i32) -> (i32, i32) {
    %c0_i32 = arith.constant 0 : i32
    %c0_i32_0 = arith.constant 0 : i32
    return %c0_i32, %arg0 : i32, i32
  }
}

</mosaic_0001>

<bundles_post_ra>
// kernel: tpu_custom_call.1
= control target key start
LH: loop header
LB: loop body
LE: loop exit
PB: predicated region body
PF: predicated region fallthrough
CT: control target
= control target key end

     0   :  { %vm46_vm0 = vcmask 130048   ;;  %s1040_s0 = inlined_call_operand.vmem [shape: f32[128,16], index: 0, kind: input, shape index: {}]   ;;  %s1041_s1 = inlined_call_operand.vmem [shape: f32[16,32], index: 1, kind: input, shape index: {}]   ;;  %s1042_s2 = inlined_call_operand.vmem [shape: f32[1,32], index: 2, kind: input, shape index: {}]   ;;  %s1043_s3 = inlined_call_operand.vmem [shape: f32[64,32], index: 3, kind: input, shape index: {}]   ;;  %s1044_s4 = inlined_call_operand.vmem [shape: f32[64,1], index: 4, kind: input, shape index: {}]   ;;  %s1045_s5 = inlined_call_operand.hbm [shape: s32[1,128], index: 5, kind: output, shape index: {}]  }
   0x1   :  { %v38_v0 = vld [vmem:[%s1041_s1 + $0x8] sm:$0xff]  ;;  %v37_v1 = vld [vmem:[%s1041_s1] sm:$0xff]  ;;  %v23_v4 = vld [vmem:[%s1040_s0 + $0x10] sm:$0xff] }
   0x2   :  { %v21_v2 = vld [vmem:[%s1040_s0] sm:$0xff]  ;;  %649 = vmatprep.subr.mxu0 %v38_v0  ;;  %v22_v3 = vld [vmem:[%s1040_s0 + $0x8] sm:$0xff]  ;;  %v24_v5 = vld [vmem:[%s1040_s0 + $0x18] sm:$0xff] }
   0x3   :  { %653 = vmatprep.mubr.msk.f32.mxu0 %vm46_vm0, %v21_v2  ;;  %650 = vmatpush3.msra.mxu0 %v38_v0 }
   0x4   :  { %651 = vmatprep.subr.mxu0 %v37_v1 }
   0x5   :  { %652 = vmatpush3.msra.mxu0 %v37_v1 }
   0x6   :  { %654 = vmatmul.mubr.msk.f32.vlgmr.msra.gmra.mxu0 %vm46_vm0, %v22_v3 }
   0x7   :  { %656 = vmatprep.mubr.msk.f32.mxu0 %vm46_vm0, %v23_v4 }
   0x8   :  { %10 = vsyncpa [#allocation3], 0  ;;  %v25_v6 = vld [vmem:[%s1040_s0 + $0x20] sm:$0xff]  ;;  %v26_v7 = vld [vmem:[%s1040_s0 + $0x28] sm:$0xff]  ;;  %vm248_vm1 = vcmask 261120   ;;  %v779_v22 = vmov 0  }
   0x9   :  { %v27_v8 = vld [vmem:[%s1040_s0 + $0x30] sm:$0xff]  ;;  %v28_v9 = vld [vmem:[%s1040_s0 + $0x38] sm:$0xff]  ;;  %v29_v10 = vld [vmem:[%s1040_s0 + $0x40] sm:$0xff]  ;;  %756 = vset.pattern.permute.xlu1 %v779_v22  ;;  %755 = vset.pattern.permute.xlu0 %v779_v22 }
   0xa   :  { %657 = vmatmul.mubr.msk.f32.gmra.mxu0 %vm46_vm0, %v24_v5  ;;  %v30_v11 = vld [vmem:[%s1040_s0 + $0x48] sm:$0xff]  ;;  %v31_v12 = vld [vmem:[%s1040_s0 + $0x50] sm:$0xff]  ;;  %v32_v13 = vld [vmem:[%s1040_s0 + $0x58] sm:$0xff] }
   0xb   :  { %659 = vmatprep.mubr.msk.f32.mxu0 %vm46_vm0, %v25_v6  ;;  %v33_v14 = vld [vmem:[%s1040_s0 + $0x60] sm:$0xff]  ;;  %v34_v15 = vld [vmem:[%s1040_s0 + $0x68] sm:$0xff]  ;;  %v35_v16 = vld [vmem:[%s1040_s0 + $0x70] sm:$0xff] }
   0xc   :  { %v36_v17 = vld [vmem:[%s1040_s0 + $0x78] sm:$0xff]  ;;  %v240_v18 = vld [vmem:[%s1043_s3] sm:$0xff]  ;;  %v242_v19 = vld [vmem:[%s1043_s3 + $0x10] sm:$0xff] }
   0xd   :  { %712 = vmatprep.mubr.msk.f32.mxu1 %vm248_vm1, %v242_v19  ;;  %v428_v20 = vld [vmem:[%s1044_s4 + $0x10] sm:$0xff]  ;;  %v426_v21 = vld [vmem:[%s1044_s4] sm:$0xff]  ;;  %v429_v23 = vld [vmem:[%s1044_s4 + $0x18] sm:$0xff] }
   0xe   :  { %660 = vmatmul.mubr.msk.f32.gmra.mxu0 %vm46_vm0, %v26_v7  ;;  %454 = vperm.xlu1 %756, %v428_v20   ;;  %v427_v24 = vld [vmem:[%s1044_s4 + $0x8] sm:$0xff]  ;;  %v430_v26 = vld [vmem:[%s1044_s4 + $0x20] sm:$0xff]  ;;  %v433_v27 = vld [vmem:[%s1044_s4 + $0x38] sm:$0xff] }
   0xf   :  { %662 = vmatprep.mubr.msk.f32.mxu0 %vm46_vm0, %v27_v8  ;;  %444 = vperm.xlu0 %755, %v426_v21   ;;  %v431_v25 = vld [vmem:[%s1044_s4 + $0x28] sm:$0xff]  ;;  %v432_v28 = vld [vmem:[%s1044_s4 + $0x30] sm:$0xff]  ;;  %v926_v43 = vld [vmem:[%s1042_s2] ss:$0 sm:$0xff] }
  0x10   :  { %v241_v62 = vld [vmem:[%s1043_s3 + $0x8] sm:$0xff]  ;;  %v243_v63 = vld [vmem:[%s1043_s3 + $0x18] sm:$0xff]  ;;  %v244_v0 = vld [vmem:[%s1043_s3 + $0x20] sm:$0xff] }
  0x11   :  { %v245_v1 = vld [vmem:[%s1043_s3 + $0x28] sm:$0xff]  ;;  %v246_v2 = vld [vmem:[%s1043_s3 + $0x30] sm:$0xff]  ;;  %v247_v3 = vld [vmem:[%s1043_s3 + $0x38] sm:$0xff]  ;;  %s780_s3 = smov [#allocation2]  }
  0x12   :  { %663 = vmatmul.mubr.msk.f32.gmra.mxu0 %vm46_vm0, %v28_v9  ;;  %459 = vperm.xlu1 %756, %v429_v23   ;;  %s558_s7 = sshll.u32 %s780_s3, 4  ;;  %s559_s7 = int_to_ptr.vmem [resolvable:$true] %s558_s7 }
  0x13   :  { %665 = vmatprep.mubr.msk.f32.mxu0 %vm46_vm0, %v29_v10  ;;  %449 = vperm.xlu0 %755, %v427_v24   ;;  %s757_s0 = scalar_lea.vmem %s559_s7, 16  ;;  %s761_s8 = scalar_lea.vmem %s559_s7, 32 }
  0x14   :  { %p758_p0 = scmp.ne.s32.totalorder %s559_s7, %s757_s0  ;;  %p762_p1 = scmp.lt.s32.totalorder %s559_s7, %s559_s7 }
  0x15   :  { %p763_p2 = scmp.lt.s32.totalorder %s761_s8, %s757_s0 }
  0x16   :  { %666 = vmatmul.mubr.msk.f32.gmra.mxu0 %vm46_vm0, %v30_v11  ;;  %469 = vperm.xlu1 %756, %v431_v25  }
  0x17   :  { %668 = vmatprep.mubr.msk.f32.mxu0 %vm46_vm0, %v31_v12  ;;  %464 = vperm.xlu0 %755, %v430_v26   ;;  %p764_p3 = por %p763_p2, %p762_p1 }
  0x19   :  { %p765_p4 = pnand %p764_p3, %p758_p0 }
  0x1a   :  { %669 = vmatmul.mubr.msk.f32.gmra.mxu0 %vm46_vm0, %v32_v13  ;;  %479 = vperm.xlu1 %756, %v433_v27  }
  0x1b   :  { %671 = vmatprep.mubr.msk.f32.mxu0 %vm46_vm0, %v33_v14  ;;  %474 = vperm.xlu0 %755, %v432_v28  }
  0x1e   :  { %672 = vmatmul.mubr.msk.f32.gmra.mxu0 %vm46_vm0, %v34_v15 }
  0x1f   :  { %674 = vmatprep.mubr.msk.f32.mxu0 %vm46_vm0, %v35_v16 }
  0x22   :  { %675 = vmatmul.mubr.msk.f32.gmra.mxu0 %vm46_vm0, %v36_v17 }
  0x23   :  { %709 = vmatprep.mubr.msk.f32.mxu0 %vm248_vm1, %v240_v18 }
  0x89   :  { %v455_v4 = vpop.permute.xlu1 %454 }
  0x8a   :  { %v445_v5 = vpop.permute.xlu0 %444 }
  0x8d   :  { %v460_v6 = vpop.permute.xlu1 %459 }
  0x8e   :  { %v450_v7 = vpop.permute.xlu0 %449 }
  0x91   :  { %v470_v11 = vpop.permute.xlu1 %469 }
  0x92   :  { %v465_v14 = vpop.permute.xlu0 %464 }
  0x95   :  { %v480_v25 = vpop.permute.xlu1 %479 }
  0xc6   :  { %v913_v29 = vpop.f32.mrf.mxu0 }
  0xc7   :  { %v167_v60 = vadd.f32 %v913_v29, %v926_v43 }
  0xc8   :  { %v915_v30 = vpop.f32.mrf.mxu0 }
  0xc9   :  { %v162_v61 = vadd.f32 %v926_v43, %v915_v30 }
  0xca   :  { %v917_v31 = vpop.f32.mrf.mxu0 }
  0xcb   :  { %v177_v58 = vadd.f32 %v917_v31, %v926_v43  ;;  %v475_v31 = vpop.permute.xlu0 %474 }
  0xcc   :  { %v919_v32 = vpop.f32.mrf.mxu0 }
  0xcd   :  { %v172_v59 = vadd.f32 %v926_v43, %v919_v32 }
  0xce   :  { %v661_v33 = vpop.f32.mrf.mxu0 }
  0xcf   :  { %v187_v56 = vadd.f32 %v661_v33, %v926_v43 }
  0xd0   :  { %v921_v34 = vpop.f32.mrf.mxu0 }
  0xd1   :  { %v182_v57 = vadd.f32 %v926_v43, %v921_v34 }
  0xd2   :  { %v664_v35 = vpop.f32.mrf.mxu0 }
  0xd3   :  { %v197_v54 = vadd.f32 %v664_v35, %v926_v43 }
  0xd4   :  { %v191_v36 = vpop.f32.mrf.mxu0 }
  0xd5   :  { %v192_v55 = vadd.f32 %v926_v43, %v191_v36 }
  0xd6   :  { %v667_v37 = vpop.f32.mrf.mxu0 }
  0xd7   :  { %v207_v52 = vadd.f32 %v667_v37, %v926_v43 }
  0xd8   :  { %v201_v38 = vpop.f32.mrf.mxu0 }
  0xd9   :  { %v202_v53 = vadd.f32 %v926_v43, %v201_v38 }
  0xda   :  { %v670_v39 = vpop.f32.mrf.mxu0 }
  0xdb   :  { %v217_v50 = vadd.f32 %v670_v39, %v926_v43 }
  0xdc   :  { %v211_v40 = vpop.f32.mrf.mxu0 }
  0xdd   :  { %v212_v51 = vadd.f32 %v926_v43, %v211_v40 }
  0xde   :  { %v673_v41 = vpop.f32.mrf.mxu0 }
  0xdf   :  { %v227_v48 = vadd.f32 %v673_v41, %v926_v43 }
  0xe0   :  { %v221_v42 = vpop.f32.mrf.mxu0 }
  0xe1   :  { %v222_v49 = vadd.f32 %v926_v43, %v221_v42 }
  0xe2   :  { %v676_v44 = vpop.f32.mrf.mxu0 }
  0xe3   :  { %v237_v45 = vadd.f32 %v676_v44, %v926_v43 }
  0xe4   :  { %v231_v46 = vpop.f32.mrf.mxu0 }
  0xe5   :  { %v232_v47 = vadd.f32 %v926_v43, %v231_v46  ;;  %677 = vmatprep.subr.msk.mxu0 %vm248_vm1, %v237_v45  ;;  %721 = vmatprep.subr.msk.mxu1 %vm248_vm1, %v237_v45 }
  0xe6   :  { %678 = vmatpush3.xpose.msk.msra.mxu0 %vm248_vm1, %v237_v45  ;;  %737 = vmatpush3.xpose.msk.msra.mxu1 %vm248_vm1, %v237_v45  ;;  %v503_v45 = vlaneseq }
  0xe7   :  { %679 = vmatprep.subr.msk.mxu0 %vm248_vm1, %v232_v47  ;;  %722 = vmatprep.subr.msk.mxu1 %vm248_vm1, %v232_v47 }
  0xea   :  { %680 = vmatpush3.xpose.msk.msra.mxu0 %vm248_vm1, %v232_v47  ;;  %738 = vmatpush3.xpose.msk.msra.mxu1 %vm248_vm1, %v232_v47 }
  0xeb   :  { %681 = vmatprep.subr.msk.mxu0 %vm248_vm1, %v227_v48  ;;  %723 = vmatprep.subr.msk.mxu1 %vm248_vm1, %v227_v48 }
  0xee   :  { %682 = vmatpush3.xpose.msk.msra.mxu0 %vm248_vm1, %v227_v48  ;;  %739 = vmatpush3.xpose.msk.msra.mxu1 %vm248_vm1, %v227_v48  ;;  %v504_v48 = vshrl.u32 %v503_v45, 7 }
  0xef   :  { %683 = vmatprep.subr.msk.mxu0 %vm248_vm1, %v222_v49  ;;  %724 = vmatprep.subr.msk.mxu1 %vm248_vm1, %v222_v49 }
  0xf2   :  { %684 = vmatpush3.xpose.msk.msra.mxu0 %vm248_vm1, %v222_v49  ;;  %740 = vmatpush3.xpose.msk.msra.mxu1 %vm248_vm1, %v222_v49 }
  0xf3   :  { %685 = vmatprep.subr.msk.mxu0 %vm248_vm1, %v217_v50  ;;  %725 = vmatprep.subr.msk.mxu1 %vm248_vm1, %v217_v50 }
  0xf6   :  { %686 = vmatpush3.xpose.msk.msra.mxu0 %vm248_vm1, %v217_v50  ;;  %741 = vmatpush3.xpose.msk.msra.mxu1 %vm248_vm1, %v217_v50 }
  0xf7   :  { %687 = vmatprep.subr.msk.mxu0 %vm248_vm1, %v212_v51  ;;  %726 = vmatprep.subr.msk.mxu1 %vm248_vm1, %v212_v51 }
  0xfa   :  { %688 = vmatpush3.xpose.msk.msra.mxu0 %vm248_vm1, %v212_v51  ;;  %742 = vmatpush3.xpose.msk.msra.mxu1 %vm248_vm1, %v212_v51  ;;  %v505_v51 = vadd.s32 8, %v504_v48 }
  0xfb   :  { %689 = vmatprep.subr.msk.mxu0 %vm248_vm1, %v207_v52  ;;  %727 = vmatprep.subr.msk.mxu1 %vm248_vm1, %v207_v52 }
  0xfe   :  { %690 = vmatpush3.xpose.msk.msra.mxu0 %vm248_vm1, %v207_v52  ;;  %743 = vmatpush3.xpose.msk.msra.mxu1 %vm248_vm1, %v207_v52  ;;  %v506_v52 = vadd.s32 16, %v504_v48 }
  0xff   :  { %691 = vmatprep.subr.msk.mxu0 %vm248_vm1, %v202_v53  ;;  %728 = vmatprep.subr.msk.mxu1 %vm248_vm1, %v202_v53 }
 0x102   :  { %692 = vmatpush3.xpose.msk.msra.mxu0 %vm248_vm1, %v202_v53  ;;  %744 = vmatpush3.xpose.msk.msra.mxu1 %vm248_vm1, %v202_v53  ;;  %v507_v53 = vadd.s32 24, %v504_v48 }
 0x103   :  { %693 = vmatprep.subr.msk.mxu0 %vm248_vm1, %v197_v54  ;;  %729 = vmatprep.subr.msk.mxu1 %vm248_vm1, %v197_v54 }
 0x106   :  { %694 = vmatpush3.xpose.msk.msra.mxu0 %vm248_vm1, %v197_v54  ;;  %745 = vmatpush3.xpose.msk.msra.mxu1 %vm248_vm1, %v197_v54  ;;  %v508_v54 = vadd.s32 32, %v504_v48 }
 0x107   :  { %695 = vmatprep.subr.msk.mxu0 %vm248_vm1, %v192_v55  ;;  %730 = vmatprep.subr.msk.mxu1 %vm248_vm1, %v192_v55 }
 0x10a   :  { %696 = vmatpush3.xpose.msk.msra.mxu0 %vm248_vm1, %v192_v55  ;;  %746 = vmatpush3.xpose.msk.msra.mxu1 %vm248_vm1, %v192_v55  ;;  %v509_v55 = vadd.s32 40, %v504_v48 }
 0x10b   :  { %697 = vmatprep.subr.msk.mxu0 %vm248_vm1, %v187_v56  ;;  %731 = vmatprep.subr.msk.mxu1 %vm248_vm1, %v187_v56 }
 0x10e   :  { %698 = vmatpush3.xpose.msk.msra.mxu0 %vm248_vm1, %v187_v56  ;;  %747 = vmatpush3.xpose.msk.msra.mxu1 %vm248_vm1, %v187_v56  ;;  %v510_v56 = vadd.s32 48, %v504_v48 }
 0x10f   :  { %699 = vmatprep.subr.msk.mxu0 %vm248_vm1, %v182_v57  ;;  %732 = vmatprep.subr.msk.mxu1 %vm248_vm1, %v182_v57 }
 0x112   :  { %700 = vmatpush3.xpose.msk.msra.mxu0 %vm248_vm1, %v182_v57  ;;  %748 = vmatpush3.xpose.msk.msra.mxu1 %vm248_vm1, %v182_v57  ;;  %v511_v57 = vadd.s32 56, %v504_v48 }
 0x113   :  { %701 = vmatprep.subr.msk.mxu0 %vm248_vm1, %v177_v58  ;;  %733 = vmatprep.subr.msk.mxu1 %vm248_vm1, %v177_v58 }
 0x116   :  { %702 = vmatpush3.xpose.msk.msra.mxu0 %vm248_vm1, %v177_v58  ;;  %749 = vmatpush3.xpose.msk.msra.mxu1 %vm248_vm1, %v177_v58 }
 0x117   :  { %703 = vmatprep.subr.msk.mxu0 %vm248_vm1, %v172_v59  ;;  %734 = vmatprep.subr.msk.mxu1 %vm248_vm1, %v172_v59 }
 0x11a   :  { %704 = vmatpush3.xpose.msk.msra.mxu0 %vm248_vm1, %v172_v59  ;;  %750 = vmatpush3.xpose.msk.msra.mxu1 %vm248_vm1, %v172_v59 }
 0x11b   :  { %705 = vmatprep.subr.msk.mxu0 %vm248_vm1, %v167_v60  ;;  %735 = vmatprep.subr.msk.mxu1 %vm248_vm1, %v167_v60 }
 0x11e   :  { %706 = vmatpush3.xpose.msk.msra.mxu0 %vm248_vm1, %v167_v60  ;;  %751 = vmatpush3.xpose.msk.msra.mxu1 %vm248_vm1, %v167_v60 }
 0x11f   :  { %707 = vmatprep.subr.msk.mxu0 %vm248_vm1, %v162_v61  ;;  %736 = vmatprep.subr.msk.mxu1 %vm248_vm1, %v162_v61 }
 0x122   :  { %708 = vmatpush3.xpose.msk.msra.mxu0 %vm248_vm1, %v162_v61  ;;  %752 = vmatpush3.xpose.msk.msra.mxu1 %vm248_vm1, %v162_v61 }
 0x125   :  { %710 = vmatmul.mubr.msk.f32.vlgmr.msra.gmra.mxu0 %vm248_vm1, %v241_v62  ;;  %713 = vmatmul.mubr.msk.f32.vlgmr.msra.gmra.mxu1 %vm248_vm1, %v243_v63 }
 0x126   :  { %715 = vmatprep.mubr.msk.f32.mxu1 %vm248_vm1, %v244_v0 }
 0x129   :  { %716 = vmatmul.mubr.msk.f32.gmra.mxu1 %vm248_vm1, %v245_v1 }
 0x12a   :  { %718 = vmatprep.mubr.msk.f32.mxu1 %vm248_vm1, %v246_v2 }
 0x12d   :  { %719 = vmatmul.mubr.msk.f32.gmra.mxu1 %vm248_vm1, %v247_v3 }
 0x1e5   :  { %v711_v8 = vpop.f32.mrf.mxu0  ;;  %v714_v9 = vpop.f32.mrf.mxu1 }
 0x1e6   :  { %v435_v19 = vmul.f32 2.0, %v711_v8  ;;  %v437_v21 = vmul.f32 2.0, %v714_v9 }
 0x1e7   :  { %v397_v10 = vpop.f32.mrf.mxu1  ;;  %v387_v12 = vpop.f32.mrf.mxu0 }
 0x1e8   :  { %v434_v16 = vmul.f32 2.0, %v387_v12  ;;  %v436_v22 = vmul.f32 2.0, %v397_v10  ;;  %v483_v32 = vsub.f32 %v450_v7, %v435_v19  ;;  %v485_v33 = vsub.f32 %v460_v6, %v437_v21 }
 0x1e9   :  { %v717_v13 = vpop.f32.mrf.mxu1 }
 0x1ea   :  { %v439_v17 = vmul.f32 2.0, %v717_v13  ;;  %v482_v27 = vsub.f32 %v445_v5, %v434_v16  ;;  %v484_v34 = vsub.f32 %v455_v4, %v436_v22 }
 0x1eb   :  { %v407_v15 = vpop.f32.mrf.mxu1 }
 0x1ec   :  { %v438_v18 = vmul.f32 2.0, %v407_v15  ;;  %v487_v28 = vsub.f32 %v470_v11, %v439_v17 }
 0x1ed   :  { %v720_v20 = vpop.f32.mrf.mxu1 }
 0x1ee   :  { %v486_v23 = vsub.f32 %v465_v14, %v438_v18  ;;  %v441_v24 = vmul.f32 2.0, %v720_v20  ;;  %v491_v37 = vmin.f32 %v483_v32, %v487_v28 }
 0x1ef   :  { %v417_v26 = vpop.f32.mrf.mxu1 }
 0x1f0   :  { %v489_v29 = vsub.f32 %v480_v25, %v441_v24  ;;  %v440_v30 = vmul.f32 2.0, %v417_v26  ;;  %v490_v35 = vmin.f32 %v482_v27, %v486_v23 }
 0x1f2   :  { %v488_v36 = vsub.f32 %v475_v31, %v440_v30  ;;  %v493_v38 = vmin.f32 %v485_v33, %v489_v29  ;;  %v494_v40 = vmin.f32 %v490_v35, %v491_v37 }
 0x1f4   :  { %v492_v39 = vmin.f32 %v484_v34, %v488_v36 }
 0x1f6   :  { %v495_v41 = vmin.f32 %v492_v39, %v493_v38 }
 0x1f8   :  { %v496_v42 = vmin.f32 %v494_v40, %v495_v41 }
 0x1fa   :  { %v497_v43 = vrot.slane %v496_v42, 4 }
 0x1fc   :  { %v498_v44 = vmin.f32 %v496_v42, %v497_v43 }
 0x1fe   :  { %v499_v46 = vrot.slane %v498_v44, 2 }
 0x200   :  { %v500_v47 = vmin.f32 %v498_v44, %v499_v46 }
 0x202   :  { %v501_v49 = vrot.slane %v500_v47, 1 }
 0x204   :  { %v502_v50 = vmin.f32 %v500_v47, %v501_v49 }
 0x206   :  { %vm512_vm2 = vcmp.le.f32.partialorder %v482_v27, %v502_v50  ;;  %vm513_vm3 = vcmp.le.f32.partialorder %v483_v32, %v502_v50  ;;  %vm514_vm4 = vcmp.le.f32.partialorder %v484_v34, %v502_v50  ;;  %vm515_vm5 = vcmp.le.f32.partialorder %v485_v33, %v502_v50 }
 0x207   :  { %vm516_vm6 = vcmp.le.f32.partialorder %v486_v23, %v502_v50  ;;  %vm517_vm7 = vcmp.le.f32.partialorder %v487_v28, %v502_v50  ;;  %vm518_vm8 = vcmp.le.f32.partialorder %v488_v36, %v502_v50  ;;  %vm519_vm9 = vcmp.le.f32.partialorder %v489_v29, %v502_v50 }
 0x208   :  { %v520_v58 = vsel %vm512_vm2, %v504_v48, 64  ;;  %v521_v59 = vsel %vm513_vm3, %v505_v51, 64  ;;  %v522_v60 = vsel %vm514_vm4, %v506_v52, 64  ;;  %v523_v61 = vsel %vm515_vm5, %v507_v53, 64 }
 0x209   :  { %v524_v62 = vsel %vm516_vm6, %v508_v54, 64  ;;  %v525_v63 = vsel %vm517_vm7, %v509_v55, 64  ;;  %v526_v0 = vsel %vm518_vm8, %v510_v56, 64  ;;  %v527_v1 = vsel %vm519_vm9, %v511_v57, 64 }
 0x20a   :  { %vm528_vm10 = vcmp.lt.s32.totalorder %v520_v58, %v524_v62  ;;  %vm530_vm11 = vcmp.lt.s32.totalorder %v521_v59, %v525_v63  ;;  %vm532_vm12 = vcmp.lt.s32.totalorder %v522_v60, %v526_v0  ;;  %vm534_vm13 = vcmp.lt.s32.totalorder %v523_v61, %v527_v1 }
 0x20b   :  { %v529_v2 = vsel %vm528_vm10, %v520_v58, %v524_v62  ;;  %v531_v3 = vsel %vm530_vm11, %v521_v59, %v525_v63  ;;  %v533_v4 = vsel %vm532_vm12, %v522_v60, %v526_v0  ;;  %v535_v5 = vsel %vm534_vm13, %v523_v61, %v527_v1 }
 0x20c   :  { %vm536_vm14 = vcmp.lt.s32.totalorder %v529_v2, %v531_v3  ;;  %vm538_vm15 = vcmp.lt.s32.totalorder %v533_v4, %v535_v5 }
 0x20d   :  { %v537_v6 = vsel %vm536_vm14, %v529_v2, %v531_v3  ;;  %v539_v7 = vsel %vm538_vm15, %v533_v4, %v535_v5 }
 0x20e   :  { %vm540_vm0 = vcmp.lt.s32.totalorder %v537_v6, %v539_v7 }
 0x20f   :  { %v541_v8 = vsel %vm540_vm0, %v537_v6, %v539_v7 }
 0x210   :  { %v542_v9 = vrot.slane %v541_v8, 4 }
 0x212   :  { %vm543_vm1 = vcmp.lt.s32.totalorder %v541_v8, %v542_v9 }
 0x213   :  { %v544_v10 = vsel %vm543_vm1, %v541_v8, %v542_v9 }
 0x214   :  { %v545_v11 = vrot.slane %v544_v10, 2 }
 0x216   :  { %vm546_vm2 = vcmp.lt.s32.totalorder %v544_v10, %v545_v11 }
 0x217   :  { %v547_v12 = vsel %vm546_vm2, %v544_v10, %v545_v11 }
 0x218   :  { %v548_v13 = vrot.slane %v547_v12, 1 }
 0x21a   :  { %vm549_vm3 = vcmp.lt.s32.totalorder %v547_v12, %v548_v13 }
 0x21b   :  { %v550_v14 = vsel %vm549_vm3, %v547_v12, %v548_v13 }
 0x21c   :  { %551 = vst [vmem:[#allocation2] sm:$0x1] %v550_v14 }
 0x21d   :  { %768 = shalt.err (!%p765_p4)
}
 0x21e   :  { %561 = dma.vmem_to_hbm [thread:$0]  %s559_s7, 16, %s1045_s5, [#allocation3]  }
 0x21f   :  { %777 = dma.done.wait [#allocation3], 16  }
 0x220   :  { %778 = vsyncadd [#allocation3], 4294967280 }
 0x221   :  { %565 = vsyncpa [#allocation3], 1 }

</bundles_post_ra>
